<compile_context>
chip_gen: v6e
topology: v6e:2x2x1
jax: 0.10.0
libtpu: 0.0.40
codegen_flags: <defaults>
</compile_context>

<pallas_src>
import jax
import jax.numpy as jnp
from jax.experimental import pallas as pl
from jax.experimental.pallas import tpu as pltpu


def _round_up(x, m):
    return ((x + m - 1) // m) * m


def _discriminator_kernel(emb_ref, pos_ref, w1a_ref, w1b_ref, b1_ref, w2_ref,
                          b2_ref, o_ref):
    """One packed row-tile: relu(lin1) -> lin2 (+ bias)."""
    # lin1 over the (virtually) concatenated input, split into two MXU dots on
    # block-diagonal weights; f32 accumulation, bias + ReLU on the VPU.
    h = jnp.dot(emb_ref[...], w1a_ref[...], preferred_element_type=jnp.float32)
    h = h + jnp.dot(pos_ref[...], w1b_ref[...], preferred_element_type=jnp.float32)
    h = jnp.maximum(h + b1_ref[...], 0.0)              # (tm, pack*H) f32

    # TODO(synk): training-mode F.dropout would need pltpu.prng_seed /
    # prng_random_bits + 1/(1-p) rescale; eval-mode dropout is the identity.

    # lin2 as a (pack*H, pack) block-diagonal matmul == per-row dot(h, w2) + b2.
    out = jnp.dot(h, w2_ref[...], preferred_element_type=jnp.float32)
    o_ref[...] = (out + b2_ref[0]).astype(o_ref.dtype)


def _pick_pack(n, hidden):
    """How many consecutive rows to fuse into one lane-dense (<=128-wide) row."""
    for p in (8, 4, 2, 1):
        if p * hidden <= 128 and n % p == 0:
            return p
    return 1


def _pick_row_tile(rows, lane_width, act_itemsize, vmem_budget_bytes):
    """Largest packed-row tile whose pipeline working set fits the VMEM budget."""
    padded_w = _round_up(lane_width, 128)
    # Per packed row: 2 activation inputs x 2 pipeline buffers (lane-padded),
    # the double-buffered (tm, pack) output block (lane-padded to 128 lanes),
    # and the f32 `h` intermediate.  Weights are tiny and shared across steps.
    bytes_per_row = (4 * padded_w * act_itemsize   # emb + pos, double-buffered
                     + 2 * 128 * 4                 # output block, double-buffered
                     + padded_w * 4)               # h intermediate (f32)
    tm = (vmem_budget_bytes // bytes_per_row) // 8 * 8
    tm = max(8, tm)
    if rows >= 8:
        tm = min(tm, (rows // 8) * 8)              # tile never exceeds the array
    else:
        tm = 8                                     # single (partial) block
    # Keep >=2 grid steps once there is enough work, so ("parallel",) can shard
    # row tiles across both TensorCores on v7x.
    if rows >= 2048 and pl.cdiv(rows, tm) < 2:
        tm = max(8, _round_up(pl.cdiv(rows, 2), 8))
    return tm


def discriminator_forward(embeddings, positive, w1, b1, w2, b2, *,
                          vmem_budget_bytes=12 * 1024 * 1024):
    """relu(lin1(concat([emb, pos], -1))) -> lin2; returns (N, 1).

    Weights use torch.nn.Linear layout: w1 (H, 2H), b1 (H,), w2 (1, H), b2 (1,).
    """
    n, hidden = embeddings.shape
    assert positive.shape == (n, hidden)
    assert w1.shape == (hidden, 2 * hidden)

    out_dtype = jnp.result_type(embeddings.dtype, w1.dtype)

    # Pack `pack` consecutive rows into one lane-dense row. Row-major reshape is
    # free (metadata only) — no HBM copy of the activations.
    pack = _pick_pack(n, hidden)
    rows = n // pack
    width = pack * hidden

    emb_p = embeddings.reshape(rows, width)
    pos_p = positive.reshape(rows, width)

    # lin1([e, p]) = e @ w1[:, :H].T + p @ w1[:, H:].T + b1, lifted to the
    # packed layout with block-diagonal weights kron(I_pack, W^T).
    eye = jnp.eye(pack, dtype=w1.dtype)
    w1a_blk = jnp.kron(eye, jnp.transpose(w1[:, :hidden]))          # (pH, pH)
    w1b_blk = jnp.kron(eye, jnp.transpose(w1[:, hidden:]))          # (pH, pH)
    b1_row = jnp.tile(b1.reshape(1, hidden), (1, pack))             # (1, pH)
    w2_blk = jnp.kron(eye, jnp.transpose(w2)).astype(jnp.float32)   # (pH, pack)
    b2_smem = b2.reshape(1).astype(jnp.float32)                     # SMEM scalar

    act_itemsize = jnp.dtype(embeddings.dtype).itemsize
    tm = _pick_row_tile(rows, width, act_itemsize, vmem_budget_bytes)
    grid = (pl.cdiv(rows, tm),)

    in_specs = [
        pl.BlockSpec((tm, width), lambda i: (i, 0)),        # packed embeddings tile
        pl.BlockSpec((tm, width), lambda i: (i, 0)),        # packed positive tile
        pl.BlockSpec((width, width), lambda i: (0, 0)),     # block-diag w1 (emb half)
        pl.BlockSpec((width, width), lambda i: (0, 0)),     # block-diag w1 (pos half)
        pl.BlockSpec((1, width), lambda i: (0, 0)),         # tiled b1
        pl.BlockSpec((width, pack), lambda i: (0, 0)),      # block-diag w2
        pl.BlockSpec(memory_space=pltpu.MemorySpace.SMEM),  # b2 scalar
    ]
    out_spec = pl.BlockSpec((tm, pack), lambda i: (i, 0))

    out_packed = pl.pallas_call(
        _discriminator_kernel,
        out_shape=jax.ShapeDtypeStruct((rows, pack), out_dtype),
        grid_spec=pltpu.PrefetchScalarGridSpec(
            num_scalar_prefetch=0,
            grid=grid,
            in_specs=in_specs,
            out_specs=out_spec,
        ),
        compiler_params=pltpu.CompilerParams(
            dimension_semantics=("parallel",),   # independent row tiles
        ),
    )(emb_p, pos_p, w1a_blk, w1b_blk, b1_row, w2_blk, b2_smem)

    # Free row-major reshape back to (N, 1): out_packed[r, j] is row r*pack + j.
    return out_packed.reshape(n, 1)


if __name__ == "__main__":
    hidden_size = 32
    n_rows = 64

    key = jax.random.PRNGKey(0)
    (k_emb, k_pos, k_w1, k_b1, k_w2, k_b2, k_e2, k_p2) = jax.random.split(key, 8)

    embeddings = jax.random.normal(k_emb, (n_rows, hidden_size), jnp.float32)
    positive = jax.random.normal(k_pos, (n_rows, hidden_size), jnp.float32)

    # Parameters in torch.nn.Linear layout: (out_features, in_features).
    w1 = jax.random.normal(k_w1, (hidden_size, 2 * hidden_size), jnp.float32) * 0.1
    b1 = jax.random.normal(k_b1, (hidden_size,), jnp.float32) * 0.1
    w2 = jax.random.normal(k_w2, (1, hidden_size), jnp.float32) * 0.1
    b2 = jax.random.normal(k_b2, (1,), jnp.float32) * 0.1

    def reference(e, p):
        cat = jnp.concatenate([e, p], axis=-1)
        return jnp.maximum(cat @ w1.T + b1, 0.0) @ w2.T + b2

    # Main case (rows divide the tile evenly).
    out = jax.block_until_ready(
        discriminator_forward(embeddings, positive, w1, b1, w2, b2))
    assert out.shape == (n_rows, 1)
    assert jnp.allclose(out, reference(embeddings, positive), atol=1e-5, rtol=1e-5), \
        "mismatch vs pure-JAX reference"

    # Ragged case: row count not a multiple of the chosen tile — exercises the
    # cdiv grid / partial last block path (no wrapper-side padding copies).
    n2 = 200
    emb2 = jax.random.normal(k_e2, (n2, hidden_size), jnp.float32)
    pos2 = jax.random.normal(k_p2, (n2, hidden_size), jnp.float32)
    out2 = jax.block_until_ready(
        discriminator_forward(emb2, pos2, w1, b1, w2, b2))
    assert out2.shape == (n2, 1)
    assert jnp.allclose(out2, reference(emb2, pos2), atol=1e-5, rtol=1e-5), \
        "ragged-tile mismatch vs pure-JAX reference"

    print("KERNEL_OK")
</pallas_src>

<mosaic_0001>
module attributes {stable_mosaic.version = 11 : i64} {
  func.func @_discriminator_kernel(%arg0: i32, %arg1: memref<16x128xf32, #tpu.memory_space<vmem>>, %arg2: memref<16x128xf32, #tpu.memory_space<vmem>>, %arg3: memref<128x128xf32, #tpu.memory_space<vmem>>, %arg4: memref<128x128xf32, #tpu.memory_space<vmem>>, %arg5: memref<1x128xf32, #tpu.memory_space<vmem>>, %arg6: memref<128x4xf32, #tpu.memory_space<vmem>>, %arg7: memref<1xf32, #tpu.memory_space<smem>>, %arg8: memref<16x4xf32, #tpu.memory_space<vmem>>) attributes {dimension_semantics = [#tpu.dimension_semantics<parallel>], iteration_bounds = array<i64: 1>, scalar_prefetch = 0 : i64, scratch_operands = 0 : i64, tpu.core_type = #tpu.core_type<tc>, window_params = [{transform_indices = @transform_0, window_bounds = array<i64: 16, 128>}, {transform_indices = @transform_1, window_bounds = array<i64: 16, 128>}, {pipeline_mode = #tpu.pipeline_mode<synchronous>, transform_indices = @transform_2, window_bounds = array<i64: 128, 128>}, {pipeline_mode = #tpu.pipeline_mode<synchronous>, transform_indices = @transform_3, window_bounds = array<i64: 128, 128>}, {pipeline_mode = #tpu.pipeline_mode<synchronous>, transform_indices = @transform_4, window_bounds = array<i64: 1, 128>}, {pipeline_mode = #tpu.pipeline_mode<synchronous>, transform_indices = @transform_5, window_bounds = array<i64: 128, 4>}, {transform_indices = @transform_6, window_bounds = array<i64: 1>}, {transform_indices = @transform_7, window_bounds = array<i64: 16, 4>}]} {
    %c0 = arith.constant 0 : index
    %c0_0 = arith.constant 0 : index
    %0 = vector.load %arg1[%c0, %c0_0] : memref<16x128xf32, #tpu.memory_space<vmem>>, vector<16x128xf32>
    %c0_1 = arith.constant 0 : index
    %c0_2 = arith.constant 0 : index
    %1 = vector.load %arg3[%c0_1, %c0_2] : memref<128x128xf32, #tpu.memory_space<vmem>>, vector<128x128xf32>
    %cst = arith.constant dense<0.000000e+00> : vector<16x128xf32>
    %2 = tpu.matmul %0, %1, %cst {dimension_numbers = #tpu.dot_dimension_numbers<[1], [0], [0], [1], [0, 0, 1, 1], [], []>} : vector<16x128xf32>, vector<128x128xf32>, vector<16x128xf32> -> vector<16x128xf32>
    %c0_3 = arith.constant 0 : index
    %c0_4 = arith.constant 0 : index
    %3 = vector.load %arg2[%c0_3, %c0_4] : memref<16x128xf32, #tpu.memory_space<vmem>>, vector<16x128xf32>
    %c0_5 = arith.constant 0 : index
    %c0_6 = arith.constant 0 : index
    %4 = vector.load %arg4[%c0_5, %c0_6] : memref<128x128xf32, #tpu.memory_space<vmem>>, vector<128x128xf32>
    %cst_7 = arith.constant dense<0.000000e+00> : vector<16x128xf32>
    %5 = tpu.matmul %3, %4, %cst_7 {dimension_numbers = #tpu.dot_dimension_numbers<[1], [0], [0], [1], [0, 0, 1, 1], [], []>} : vector<16x128xf32>, vector<128x128xf32>, vector<16x128xf32> -> vector<16x128xf32>
    %6 = arith.addf %2, %5 : vector<16x128xf32>
    %c0_8 = arith.constant 0 : index
    %c0_9 = arith.constant 0 : index
    %7 = vector.load %arg5[%c0_8, %c0_9] : memref<1x128xf32, #tpu.memory_space<vmem>>, vector<1x128xf32>
    %8 = vector.broadcast %7 : vector<1x128xf32> to vector<16x128xf32>
    %9 = arith.addf %6, %8 : vector<16x128xf32>
    %cst_10 = arith.constant 0.000000e+00 : f32
    %10 = vector.broadcast %cst_10 : f32 to vector<16x128xf32>
    %11 = arith.maximumf %9, %10 : vector<16x128xf32>
    %c0_11 = arith.constant 0 : index
    %c0_12 = arith.constant 0 : index
    %12 = vector.load %arg6[%c0_11, %c0_12] : memref<128x4xf32, #tpu.memory_space<vmem>>, vector<128x4xf32>
    %cst_13 = arith.constant dense<0.000000e+00> : vector<16x4xf32>
    %13 = tpu.matmul %11, %12, %cst_13 {dimension_numbers = #tpu.dot_dimension_numbers<[1], [0], [0], [1], [0, 0, 1, 1], [], []>} : vector<16x128xf32>, vector<128x4xf32>, vector<16x4xf32> -> vector<16x4xf32>
    %c0_14 = arith.constant 0 : index
    %14 = memref.load %arg7[%c0_14] : memref<1xf32, #tpu.memory_space<smem>>
    %15 = vector.broadcast %14 : f32 to vector<16x4xf32>
    %16 = arith.addf %13, %15 : vector<16x4xf32>
    %c0_15 = arith.constant 0 : index
    %c0_16 = arith.constant 0 : index
    %17 = vector.load %arg8[%c0_15, %c0_16] : memref<16x4xf32, #tpu.memory_space<vmem>>, vector<16x4xf32>
    tpu.vector_store %arg8[%c0_15, %c0_16], %16 {strides = array<i32>} : memref<16x4xf32, #tpu.memory_space<vmem>>, vector<16x4xf32>,
    return
  }
  func.func @transform_0(%arg0: i32) -> (i32, i32) {
    %c0_i32 = arith.constant 0 : i32
    %c0_i32_0 = arith.constant 0 : i32
    return %arg0, %c0_i32 : i32, i32
  }
  func.func @transform_1(%arg0: i32) -> (i32, i32) {
    %c0_i32 = arith.constant 0 : i32
    %c0_i32_0 = arith.constant 0 : i32
    return %arg0, %c0_i32 : i32, i32
  }
  func.func @transform_2(%arg0: i32) -> (i32, i32) {
    %c0_i32 = arith.constant 0 : i32
    %c0_i32_0 = arith.constant 0 : i32
    %c0_i32_1 = arith.constant 0 : i32
    return %c0_i32, %c0_i32_0 : i32, i32
  }
  func.func @transform_3(%arg0: i32) -> (i32, i32) {
    %c0_i32 = arith.constant 0 : i32
    %c0_i32_0 = arith.constant 0 : i32
    %c0_i32_1 = arith.constant 0 : i32
    return %c0_i32, %c0_i32_0 : i32, i32
  }
  func.func @transform_4(%arg0: i32) -> (i32, i32) {
    %c0_i32 = arith.constant 0 : i32
    %c0_i32_0 = arith.constant 0 : i32
    %c0_i32_1 = arith.constant 0 : i32
    return %c0_i32, %c0_i32_0 : i32, i32
  }
  func.func @transform_5(%arg0: i32) -> (i32, i32) {
    %c0_i32 = arith.constant 0 : i32
    %c0_i32_0 = arith.constant 0 : i32
    %c0_i32_1 = arith.constant 0 : i32
    return %c0_i32, %c0_i32_0 : i32, i32
  }
  func.func @transform_6(%arg0: i32) -> i32 {
    %c0_i32 = arith.constant 0 : i32
    %c0_i32_0 = arith.constant 0 : i32
    return %c0_i32 : i32
  }
  func.func @transform_7(%arg0: i32) -> (i32, i32) {
    %c0_i32 = arith.constant 0 : i32
    %c0_i32_0 = arith.constant 0 : i32
    return %arg0, %c0_i32 : i32, i32
  }
}

</mosaic_0001>

<bundles_post_ra>
// kernel: tpu_custom_call.1
= control target key start
LH: loop header
LB: loop body
LE: loop exit
PB: predicated region body
PF: predicated region fallthrough
CT: control target
= control target key end

     0   :  { %13 = vsyncpa [#allocation4], 0  ;;  %s758_s0 = inlined_call_operand.hbm [shape: f32[16,128], index: 0, kind: input, shape index: {}]   ;;  %s759_s1 = inlined_call_operand.hbm [shape: f32[16,128], index: 1, kind: input, shape index: {}]   ;;  %s760_s2 = inlined_call_operand.vmem [shape: f32[128,128], index: 2, kind: input, shape index: {}]   ;;  %s761_s3 = inlined_call_operand.hbm [shape: f32[128,128], index: 3, kind: input, shape index: {}]   ;;  %s762_s4 = inlined_call_operand.vmem [shape: f32[1,128], index: 4, kind: input, shape index: {}]   ;;  %s763_s5 = inlined_call_operand.vmem [shape: f32[128,4], index: 5, kind: input, shape index: {}]   ;;  %s764_s6 = inlined_call_operand.<no memory space> [shape: f32[1], index: 6, kind: input, shape index: {}]   ;;  %s765_s7 = inlined_call_operand.vmem [shape: f32[16,4], index: 7, kind: output, shape index: {}]  }
   0x1   :  { %14 = vsyncpa [#allocation6], 0  ;;  %s596_s24 = smov [#allocation5]   ;;  %s597_s26 = smov [#allocation3]  }
   0x2   :  { %s32_s25 = sshll.u32 %s596_s24, 4  ;;  %s20_s27 = sshll.u32 %s597_s26, 4  ;;  %s33_s25 = int_to_ptr.vmem [resolvable:$true] %s32_s25  ;;  %s21_s27 = int_to_ptr.vmem [resolvable:$true] %s20_s27 }
   0x3   :  { %s540_s28 = scalar_lea.vmem %s33_s25, 256  ;;  %p545_p1 = scmp.lt.s32.totalorder %s33_s25, %s33_s25 }
   0x4   :  { %p541_p0 = scmp.ne.s32.totalorder %s33_s25, %s540_s28  ;;  %p546_p2 = scmp.lt.s32.totalorder %s540_s28, %s540_s28 }
   0x6   :  { %p547_p3 = por %p546_p2, %p545_p1 }
   0x8   :  { %p548_p4 = pnand %p547_p3, %p541_p0 }
   0xa   :  { %551 = shalt.err (!%p548_p4)
}
   0xb   :  { %s598_s29 = smov 128   ;;  %s599_s30 = smov 8  }
   0xc   :  { %38 = dma.hbm_to_vmem [thread:$0]  %s759_s1, 256, %s33_s25, [#allocation6], %s598_s29, %s598_s29, %s599_s30  }
   0xd   :  { %s560_s10 = scalar_lea.vmem %s21_s27, 256  ;;  %p565_p6 = scmp.lt.s32.totalorder %s21_s27, %s21_s27 }
   0xe   :  { %p561_p5 = scmp.ne.s32.totalorder %s21_s27, %s560_s10  ;;  %p566_p7 = scmp.lt.s32.totalorder %s560_s10, %s560_s10 }
  0x10   :  { %p567_p8 = por %p566_p7, %p565_p6 }
  0x12   :  { %p568_p9 = pnand %p567_p8, %p561_p5 }
  0x14   :  { %571 = shalt.err (!%p568_p9)
}
  0x15   :  { %26 = dma.hbm_to_vmem [thread:$0]  %s758_s0, 256, %s21_s27, [#allocation4], %s598_s29, %s598_s29, %s599_s30  }
  0x16   :  { %s600_s13 = smov [#allocation7]  }
  0x17   :  { %s46_s14 = sshll.u32 %s600_s13, 4  ;;  %s47_s14 = int_to_ptr.vmem [resolvable:$true] %s46_s14 }
  0x18   :  { %s580_s15 = scalar_lea.vmem %s47_s14, 2048  ;;  %p585_p11 = scmp.lt.s32.totalorder %s47_s14, %s47_s14 }
  0x19   :  { %p581_p10 = scmp.ne.s32.totalorder %s47_s14, %s580_s15  ;;  %p586_p12 = scmp.lt.s32.totalorder %s580_s15, %s580_s15 }
  0x1b   :  { %p587_p13 = por %p586_p12, %p585_p11 }
  0x1d   :  { %p588_p0 = pnand %p587_p13, %p581_p10 }
  0x1f   :  { %591 = shalt.err (!%p588_p0)
}
  0x20   :  { %52 = dma.hbm_to_vmem [thread:$0]  %s761_s3, 2048, %s47_s14, [#allocation6], %s598_s29, %s598_s29, %s599_s30  }
  0x21   :  { %592 = dma.done.wait [#allocation4], 256  }
  0x22   :  { %593 = vsyncadd [#allocation4], 4294967040 }
  0x23   :  { %594 = dma.done.wait [#allocation6], 2304  }
  0x24   :  { %595 = vsyncadd [#allocation6], 4294964992  ;;  %v103_v0 = vld [vmem:[#allocation7 + $0x78] sm:$0xff]  ;;  %v102_v2 = vld [vmem:[#allocation7 + $0x70] sm:$0xff]  ;;  %v282_v63 = vstv %s764_s6  ;;  %vm358_vm0 = vcmask 31744  }
  0x25   :  { %v85_v1 = vld [vmem:[%s760_s2 + $0x78] sm:$0xff]  ;;  %422 = vmatprep.subr.mxu0 %v103_v0  ;;  %v84_v3 = vld [vmem:[%s760_s2 + $0x70] sm:$0xff]  ;;  %v101_v4 = vld [vmem:[#allocation7 + $0x68] sm:$0xff] }
  0x26   :  { %457 = vmatprep.subr.mxu1 %v85_v1  ;;  %423 = vmatpush3.msra.mxu0 %v103_v0  ;;  %v83_v5 = vld [vmem:[%s760_s2 + $0x68] sm:$0xff]  ;;  %v100_v6 = vld [vmem:[#allocation7 + $0x60] sm:$0xff]  ;;  %v99_v8 = vld [vmem:[#allocation7 + $0x58] sm:$0xff] }
  0x27   :  { %458 = vmatpush3.msra.mxu1 %v85_v1  ;;  %424 = vmatprep.subr.mxu0 %v102_v2  ;;  %v82_v7 = vld [vmem:[%s760_s2 + $0x60] sm:$0xff]  ;;  %v81_v9 = vld [vmem:[%s760_s2 + $0x58] sm:$0xff]  ;;  %v98_v10 = vld [vmem:[#allocation7 + $0x50] sm:$0xff] }
  0x28   :  { %459 = vmatprep.subr.mxu1 %v84_v3  ;;  %425 = vmatpush3.msra.mxu0 %v102_v2  ;;  %v80_v11 = vld [vmem:[%s760_s2 + $0x50] sm:$0xff]  ;;  %v97_v12 = vld [vmem:[#allocation7 + $0x48] sm:$0xff]  ;;  %v96_v14 = vld [vmem:[#allocation7 + $0x40] sm:$0xff] }
  0x29   :  { %460 = vmatpush3.msra.mxu1 %v84_v3  ;;  %426 = vmatprep.subr.mxu0 %v101_v4  ;;  %v79_v13 = vld [vmem:[%s760_s2 + $0x48] sm:$0xff]  ;;  %v78_v15 = vld [vmem:[%s760_s2 + $0x40] sm:$0xff]  ;;  %v95_v16 = vld [vmem:[#allocation7 + $0x38] sm:$0xff] }
  0x2a   :  { %461 = vmatprep.subr.mxu1 %v83_v5  ;;  %427 = vmatpush3.msra.mxu0 %v101_v4  ;;  %v77_v17 = vld [vmem:[%s760_s2 + $0x38] sm:$0xff]  ;;  %v94_v18 = vld [vmem:[#allocation7 + $0x30] sm:$0xff]  ;;  %v93_v20 = vld [vmem:[#allocation7 + $0x28] sm:$0xff] }
  0x2b   :  { %462 = vmatpush3.msra.mxu1 %v83_v5  ;;  %428 = vmatprep.subr.mxu0 %v100_v6  ;;  %v76_v19 = vld [vmem:[%s760_s2 + $0x30] sm:$0xff]  ;;  %v75_v21 = vld [vmem:[%s760_s2 + $0x28] sm:$0xff]  ;;  %v92_v22 = vld [vmem:[#allocation7 + $0x20] sm:$0xff] }
  0x2c   :  { %463 = vmatprep.subr.mxu1 %v82_v7  ;;  %429 = vmatpush3.msra.mxu0 %v100_v6  ;;  %v74_v23 = vld [vmem:[%s760_s2 + $0x20] sm:$0xff]  ;;  %v91_v24 = vld [vmem:[#allocation7 + $0x18] sm:$0xff]  ;;  %v90_v26 = vld [vmem:[#allocation7 + $0x10] sm:$0xff] }
  0x2d   :  { %464 = vmatpush3.msra.mxu1 %v82_v7  ;;  %430 = vmatprep.subr.mxu0 %v99_v8  ;;  %v73_v25 = vld [vmem:[%s760_s2 + $0x18] sm:$0xff]  ;;  %v72_v27 = vld [vmem:[%s760_s2 + $0x10] sm:$0xff]  ;;  %v89_v28 = vld [vmem:[#allocation7 + $0x8] sm:$0xff] }
  0x2e   :  { %465 = vmatprep.subr.mxu1 %v81_v9  ;;  %431 = vmatpush3.msra.mxu0 %v99_v8  ;;  %v71_v29 = vld [vmem:[%s760_s2 + $0x8] sm:$0xff]  ;;  %v88_v30 = vld [vmem:[#allocation7] sm:$0xff]  ;;  %v86_v32 = vld [vmem:[#allocation5] sm:$0xff] }
  0x2f   :  { %466 = vmatpush3.msra.mxu1 %v81_v9  ;;  %432 = vmatprep.subr.mxu0 %v98_v10  ;;  %v70_v31 = vld [vmem:[%s760_s2] sm:$0xff]  ;;  %v87_v34 = vld [vmem:[#allocation5 + $0x8] sm:$0xff]  ;;  %v69_v35 = vld [vmem:[#allocation3 + $0x8] sm:$0xff] }
  0x30   :  { %467 = vmatprep.subr.mxu1 %v80_v11  ;;  %433 = vmatpush3.msra.mxu0 %v98_v10  ;;  %v68_v33 = vld [vmem:[#allocation3] sm:$0xff]  ;;  %v280_v36 = vld [vmem:[%s763_s5 + $0x78] sm:$0xff]  ;;  %v279_v37 = vld [vmem:[%s763_s5 + $0x70] sm:$0xff] }
  0x31   :  { %468 = vmatpush3.msra.mxu1 %v80_v11  ;;  %434 = vmatprep.subr.mxu0 %v97_v12  ;;  %v278_v38 = vld [vmem:[%s763_s5 + $0x68] sm:$0xff]  ;;  %v277_v39 = vld [vmem:[%s763_s5 + $0x60] sm:$0xff]  ;;  %v276_v40 = vld [vmem:[%s763_s5 + $0x58] sm:$0xff] }
  0x32   :  { %469 = vmatprep.subr.mxu1 %v79_v13  ;;  %435 = vmatpush3.msra.mxu0 %v97_v12  ;;  %v275_v41 = vld [vmem:[%s763_s5 + $0x50] sm:$0xff]  ;;  %v274_v42 = vld [vmem:[%s763_s5 + $0x48] sm:$0xff]  ;;  %v273_v43 = vld [vmem:[%s763_s5 + $0x40] sm:$0xff] }
  0x33   :  { %470 = vmatpush3.msra.mxu1 %v79_v13  ;;  %436 = vmatprep.subr.mxu0 %v96_v14  ;;  %v272_v44 = vld [vmem:[%s763_s5 + $0x38] sm:$0xff]  ;;  %v271_v45 = vld [vmem:[%s763_s5 + $0x30] sm:$0xff]  ;;  %v270_v46 = vld [vmem:[%s763_s5 + $0x28] sm:$0xff] }
  0x34   :  { %471 = vmatprep.subr.mxu1 %v78_v15  ;;  %437 = vmatpush3.msra.mxu0 %v96_v14  ;;  %v269_v47 = vld [vmem:[%s763_s5 + $0x20] sm:$0xff]  ;;  %v268_v48 = vld [vmem:[%s763_s5 + $0x18] sm:$0xff]  ;;  %v267_v49 = vld [vmem:[%s763_s5 + $0x10] sm:$0xff] }
  0x35   :  { %472 = vmatpush3.msra.mxu1 %v78_v15  ;;  %438 = vmatprep.subr.mxu0 %v95_v16  ;;  %v266_v50 = vld [vmem:[%s763_s5 + $0x8] sm:$0xff]  ;;  %v265_v51 = vld [vmem:[%s763_s5] sm:$0xff] }
  0x36   :  { %473 = vmatprep.subr.mxu1 %v77_v17  ;;  %439 = vmatpush3.msra.mxu0 %v95_v16  ;;  %v367_v55 = vld [vmem:[%s762_s4] ss:$0 sm:$0xff] }
  0x37   :  { %474 = vmatpush3.msra.mxu1 %v77_v17  ;;  %440 = vmatprep.subr.mxu0 %v94_v18 }
  0x38   :  { %475 = vmatprep.subr.mxu1 %v76_v19  ;;  %441 = vmatpush3.msra.mxu0 %v94_v18 }
  0x39   :  { %476 = vmatpush3.msra.mxu1 %v76_v19  ;;  %442 = vmatprep.subr.mxu0 %v93_v20 }
  0x3a   :  { %477 = vmatprep.subr.mxu1 %v75_v21  ;;  %443 = vmatpush3.msra.mxu0 %v93_v20 }
  0x3b   :  { %478 = vmatpush3.msra.mxu1 %v75_v21  ;;  %444 = vmatprep.subr.mxu0 %v92_v22 }
  0x3c   :  { %479 = vmatprep.subr.mxu1 %v74_v23  ;;  %445 = vmatpush3.msra.mxu0 %v92_v22 }
  0x3d   :  { %480 = vmatpush3.msra.mxu1 %v74_v23  ;;  %446 = vmatprep.subr.mxu0 %v91_v24 }
  0x3e   :  { %481 = vmatprep.subr.mxu1 %v73_v25  ;;  %447 = vmatpush3.msra.mxu0 %v91_v24 }
  0x3f   :  { %482 = vmatpush3.msra.mxu1 %v73_v25  ;;  %448 = vmatprep.subr.mxu0 %v90_v26 }
  0x40   :  { %483 = vmatprep.subr.mxu1 %v72_v27  ;;  %449 = vmatpush3.msra.mxu0 %v90_v26 }
  0x41   :  { %484 = vmatpush3.msra.mxu1 %v72_v27  ;;  %450 = vmatprep.subr.mxu0 %v89_v28 }
  0x42   :  { %485 = vmatprep.subr.mxu1 %v71_v29  ;;  %451 = vmatpush3.msra.mxu0 %v89_v28 }
  0x43   :  { %486 = vmatpush3.msra.mxu1 %v71_v29  ;;  %452 = vmatprep.subr.mxu0 %v88_v30 }
  0x44   :  { %487 = vmatprep.subr.mxu1 %v70_v31  ;;  %453 = vmatpush3.msra.mxu0 %v88_v30 }
  0x45   :  { %454 = vmatprep.mubr.f32.mxu0 %v86_v32  ;;  %488 = vmatpush3.msra.mxu1 %v70_v31 }
  0x46   :  { %489 = vmatprep.mubr.f32.mxu1 %v68_v33  ;;  %455 = vmatmul.mubr.f32.vlgmr.msra.gmra.mxu0 %v87_v34 }
  0x47   :  { %490 = vmatmul.mubr.f32.vlgmr.msra.gmra.mxu1 %v69_v35  ;;  %492 = vmatprep.subr.mxu0 %v280_v36 }
  0x48   :  { %493 = vmatpush3.msra.mxu0 %v280_v36 }
  0x49   :  { %494 = vmatprep.subr.mxu0 %v279_v37 }
  0x4a   :  { %495 = vmatpush3.msra.mxu0 %v279_v37 }
  0x4b   :  { %496 = vmatprep.subr.mxu0 %v278_v38 }
  0x4c   :  { %497 = vmatpush3.msra.mxu0 %v278_v38 }
  0x4d   :  { %498 = vmatprep.subr.mxu0 %v277_v39 }
  0x4e   :  { %499 = vmatpush3.msra.mxu0 %v277_v39 }
  0x4f   :  { %500 = vmatprep.subr.mxu0 %v276_v40 }
  0x50   :  { %501 = vmatpush3.msra.mxu0 %v276_v40 }
  0x51   :  { %502 = vmatprep.subr.mxu0 %v275_v41 }
  0x52   :  { %503 = vmatpush3.msra.mxu0 %v275_v41 }
  0x53   :  { %504 = vmatprep.subr.mxu0 %v274_v42 }
  0x54   :  { %505 = vmatpush3.msra.mxu0 %v274_v42 }
  0x55   :  { %506 = vmatprep.subr.mxu0 %v273_v43 }
  0x56   :  { %507 = vmatpush3.msra.mxu0 %v273_v43 }
  0x57   :  { %508 = vmatprep.subr.mxu0 %v272_v44 }
  0x58   :  { %509 = vmatpush3.msra.mxu0 %v272_v44 }
  0x59   :  { %510 = vmatprep.subr.mxu0 %v271_v45 }
  0x5a   :  { %511 = vmatpush3.msra.mxu0 %v271_v45 }
  0x5b   :  { %512 = vmatprep.subr.mxu0 %v270_v46 }
  0x5c   :  { %513 = vmatpush3.msra.mxu0 %v270_v46 }
  0x5d   :  { %514 = vmatprep.subr.mxu0 %v269_v47 }
  0x5e   :  { %515 = vmatpush3.msra.mxu0 %v269_v47 }
  0x5f   :  { %516 = vmatprep.subr.mxu0 %v268_v48 }
  0x60   :  { %517 = vmatpush3.msra.mxu0 %v268_v48 }
  0x61   :  { %518 = vmatprep.subr.mxu0 %v267_v49 }
  0x62   :  { %519 = vmatpush3.msra.mxu0 %v267_v49 }
  0x63   :  { %520 = vmatprep.subr.mxu0 %v266_v50 }
  0x64   :  { %521 = vmatpush3.msra.mxu0 %v266_v50 }
  0x65   :  { %522 = vmatprep.subr.mxu0 %v265_v51 }
  0x66   :  { %523 = vmatpush3.msra.mxu0 %v265_v51 }
 0x106   :  { %v456_v52 = vpop.f32.mrf.mxu0 }
 0x107   :  { %v491_v53 = vpop.f32.mrf.mxu1 }
 0x108   :  { %v251_v54 = vadd.f32 %v491_v53, %v456_v52  ;;  %v170_v56 = vpop.f32.mrf.mxu0 }
 0x109   :  { %v245_v57 = vpop.f32.mrf.mxu1 }
 0x10a   :  { %v246_v58 = vadd.f32 %v245_v57, %v170_v56  ;;  %v262_v59 = vadd.f32 %v367_v55, %v251_v54 }
 0x10c   :  { %v261_v60 = vadd.f32 %v367_v55, %v246_v58  ;;  %v264_v62 = vmax.f32 %v262_v59, 0.0 }
 0x10e   :  { %v263_v61 = vmax.f32 %v261_v60, 0.0 }
 0x110   :  { %524 = vmatprep.mubr.f32.mxu0 %v263_v61 }
 0x111   :  { %525 = vmatmul.mubr.f32.vlgmr.msra.gmra.mxu0 %v264_v62 }
 0x1d1   :  { %v526_v0 = vpop.f32.mrf.mxu0 }
 0x1d2   :  { %v355_v1 = vadd.f32 %v526_v0, %v282_v63 }
 0x1d3   :  { %v349_v2 = vpop.f32.mrf.mxu0 }
 0x1d4   :  { %360 = vst.msk [vmem:[%s765_s7 + $0x8] sm:$0xff] %vm358_vm0, %v355_v1  ;;  %v350_v3 = vadd.f32 %v349_v2, %v282_v63 }
 0x1d6   :  { %359 = vst.msk [vmem:[%s765_s7] sm:$0xff] %vm358_vm0, %v350_v3 }
 0x1d7   :  { %365 = vsyncpa [#allocation4], 1 }
 0x1d8   :  { %366 = vsyncpa [#allocation6], 1 }

</bundles_post_ra>
